<compile_context>
chip_gen: v7x
topology: tpu7x:2x2x1
jax: 0.10.0
libtpu: 0.0.40
codegen_flags: <defaults>
</compile_context>

<pallas_src>
import jax
import jax.numpy as jnp
from jax.experimental import pallas as pl
from jax.experimental.pallas import tpu as pltpu


def reward_kernel(obs_ref, act_ref, nobs_ref, w_ref, sp_ref, o_ref, x_scr):
    """One grid step processes `block_b` batch rows.

    w_ref  : (k_pad + hidden, hidden)  merged [W1_zero_padded ; W2]  (bf16 or f32)
    sp_ref : (4, hidden) f32           rows = [b1 ; b2 ; w_q^T ; (b_q, 0, ...)]
    o_ref  : (1, block_b) f32          lane-dense reward row
    x_scr  : (block_b, k_pad) f32      zero-padded packed input operand
    """
    obs_dim = obs_ref.shape[1]
    act_dim = act_ref.shape[1]
    in_dim = 2 * obs_dim + act_dim
    hidden = w_ref.shape[1]
    k_pad = x_scr.shape[1]

    # Pack obs | act | next_obs into one zero-padded (block_b, k_pad) operand:
    # zero the scratch (pad lanes must be 0, not stale VMEM), then 3 masked stores.
    x_scr[...] = jnp.zeros_like(x_scr)
    x_scr[:, 0:obs_dim] = obs_ref[...]
    x_scr[:, obs_dim:obs_dim + act_dim] = act_ref[...]
    x_scr[:, obs_dim + act_dim:in_dim] = nobs_ref[...]

    wdt = w_ref.dtype
    w1 = w_ref[0:k_pad, :]                    # tile-aligned static slices (free views)
    w2 = w_ref[k_pad:k_pad + hidden, :]
    b1 = sp_ref[0:1, :]
    b2 = sp_ref[1:2, :]
    wq = sp_ref[2:3, :]
    bq = sp_ref[3:4, 0:1]

    # fc1 + relu: single K-padded MXU matmul, f32 accumulation, f32 VPU epilogue.
    h1 = jnp.dot(x_scr[...].astype(wdt), w1, preferred_element_type=jnp.float32)
    h1 = jnp.maximum(h1 + b1, 0.0)

    # fc2 + relu.
    h2 = jnp.dot(h1.astype(wdt), w2, preferred_element_type=jnp.float32)
    h2 = jnp.maximum(h2 + b2, 0.0)

    # fc_q (hidden -> 1), computed transposed so the result is a lane-dense
    # (1, block_b) row: one unmasked row store instead of (B,1) masked stores.
    o_ref[...] = jnp.dot(wq, h2.T, preferred_element_type=jnp.float32) + bq


def _pick_block_b(batch):
    """Batch rows per grid step.  256 stays comfortably inside v7x's 64 MiB
    VMEM and feeds both TensorCores; v5e/v6e would also tolerate 512-1024."""
    if batch <= 256:
        return batch
    for blk in (256, 128, 64, 32, 16, 8):
        if batch % blk == 0:
            return blk
    return batch


@jax.jit
def reward_forward(obs, acts, next_obs, packed):
    """obs (B,obs_dim), acts (B,act_dim), next_obs (B,obs_dim) f32 -> (B,1) f32."""
    w_all, sp = packed
    batch, obs_dim = obs.shape
    act_dim = acts.shape[1]
    hidden = w_all.shape[1]
    k_pad = w_all.shape[0] - hidden
    block_b = _pick_block_b(batch)

    out_row = pl.pallas_call(
        reward_kernel,
        out_shape=jax.ShapeDtypeStruct((1, batch), jnp.float32),
        grid_spec=pltpu.PrefetchScalarGridSpec(
            num_scalar_prefetch=0,
            grid=(batch // block_b,),
            in_specs=[
                pl.BlockSpec((block_b, obs_dim), lambda i: (i, 0)),
                pl.BlockSpec((block_b, act_dim), lambda i: (i, 0)),
                pl.BlockSpec((block_b, obs_dim), lambda i: (i, 0)),
                pl.BlockSpec(w_all.shape, lambda i: (0, 0)),  # weights stay VMEM-resident
                pl.BlockSpec(sp.shape, lambda i: (0, 0)),
            ],
            out_specs=pl.BlockSpec((1, block_b), lambda i: (0, i)),
            scratch_shapes=[pltpu.VMEM((block_b, k_pad), jnp.float32)],
        ),
        compiler_params=pltpu.CompilerParams(dimension_semantics=("parallel",)),
    )(obs, acts, next_obs, w_all, sp)
    # (1, B) -> (B, 1): pure metadata reshape in the wrapper.
    return out_row.reshape(batch, 1)


def init_params(key, obs_dim, act_dim, hidden=256):
    """Raw f32 params mimicking nn.Linear default init.
    Weights stored as [in_features, out_features]; biases as [out_features]."""
    in_dim = 2 * obs_dim + act_dim
    ks = jax.random.split(key, 6)

    def lin(kw, kb, fan_in, fan_out):
        bound = 1.0 / jnp.sqrt(fan_in)
        w = jax.random.uniform(kw, (fan_in, fan_out), jnp.float32, -bound, bound)
        b = jax.random.uniform(kb, (fan_out,), jnp.float32, -bound, bound)
        return w, b

    w1, b1 = lin(ks[0], ks[1], in_dim, hidden)
    w2, b2 = lin(ks[2], ks[3], hidden, hidden)
    wq, bq = lin(ks[4], ks[5], hidden, 1)
    return (w1, b1, w2, b2, wq, bq)


def pack_params(raw, weight_dtype=jnp.bfloat16):
    """One-time repack: zero-pad W1's input axis to a multiple of 128, stack
    [W1_pad ; W2] into one merged weight array (single DMA, tile-aligned
    chunks), and pack b1 / b2 / w_q^T / b_q into one (4, hidden) f32 array.
    Use weight_dtype=jnp.float32 for exact-f32 MXU operands."""
    w1, b1, w2, b2, wq, bq = raw
    in_dim, hidden = w1.shape
    k_pad = ((in_dim + 127) // 128) * 128
    w1p = jnp.zeros((k_pad, hidden), jnp.float32).at[:in_dim].set(w1)
    w_all = jnp.concatenate([w1p, w2], axis=0).astype(weight_dtype)
    sp = jnp.zeros((4, hidden), jnp.float32)
    sp = sp.at[0].set(b1).at[1].set(b2).at[2].set(wq[:, 0]).at[3, 0].set(bq[0])
    return (w_all, sp)


def reward_ref(obs, acts, next_obs, raw):
    """Pure-JAX f32 reference (semantics of the PyTorch forward)."""
    w1, b1, w2, b2, wq, bq = raw
    h = jnp.concatenate([obs, acts, next_obs], axis=-1)
    h = jnp.maximum(h @ w1 + b1, 0.0)
    h = jnp.maximum(h @ w2 + b2, 0.0)
    return h @ wq + bq


if __name__ == "__main__":
    key = jax.random.PRNGKey(0)
    _, _, _, k_p = jax.random.split(key, 4)

    obs_dim, act_dim, hidden = 16, 8, 256
    raw = init_params(k_p, obs_dim, act_dim, hidden)
    packed = pack_params(raw)   # bf16 MXU weights (perf default); use float32 for exact

    # batch=8 exercises the single-block path; batch=512 exercises the
    # parallel batch grid (weights resident, activations pipelined).
    for batch in (8, 512):
        ko, ka, kn = jax.random.split(jax.random.fold_in(key, batch), 3)
        obs = jax.random.normal(ko, (batch, obs_dim), jnp.float32)
        acts = jax.random.normal(ka, (batch, act_dim), jnp.float32)
        next_obs = jax.random.normal(kn, (batch, obs_dim), jnp.float32)

        out = jax.block_until_ready(reward_forward(obs, acts, next_obs, packed))
        ref = reward_ref(obs, acts, next_obs, raw)

        assert out.shape == (batch, 1), out.shape
        max_err = float(jnp.max(jnp.abs(out - ref)))
        assert jnp.allclose(out, ref, atol=3e-2, rtol=3e-2), (
            f"batch={batch}: mismatch vs f32 reference, max abs err = {max_err}")

    print("KERNEL_OK")
</pallas_src>

<mosaic_0001>
module attributes {stable_mosaic.version = 11 : i64} {
  func.func @reward_kernel(%arg0: i32, %arg1: memref<8x16xf32, #tpu.memory_space<vmem>>, %arg2: memref<8x8xf32, #tpu.memory_space<vmem>>, %arg3: memref<8x16xf32, #tpu.memory_space<vmem>>, %arg4: memref<384x256xbf16, #tpu.memory_space<vmem>>, %arg5: memref<4x256xf32, #tpu.memory_space<vmem>>, %arg6: memref<1x8xf32, #tpu.memory_space<vmem>>, %arg7: memref<8x128xf32, #tpu.memory_space<vmem>>) attributes {dimension_semantics = [#tpu.dimension_semantics<parallel>], iteration_bounds = array<i64: 1>, scalar_prefetch = 0 : i64, scratch_operands = 1 : i64, tpu.core_type = #tpu.core_type<tc>, window_params = [{transform_indices = @transform_0, window_bounds = array<i64: 8, 16>}, {transform_indices = @transform_1, window_bounds = array<i64: 8, 8>}, {transform_indices = @transform_2, window_bounds = array<i64: 8, 16>}, {pipeline_mode = #tpu.pipeline_mode<synchronous>, transform_indices = @transform_3, window_bounds = array<i64: 384, 256>}, {pipeline_mode = #tpu.pipeline_mode<synchronous>, transform_indices = @transform_4, window_bounds = array<i64: 4, 256>}, {transform_indices = @transform_5, window_bounds = array<i64: 1, 8>}]} {
    %cst = arith.constant 0.000000e+00 : f32
    %0 = vector.broadcast %cst : f32 to vector<8x128xf32>
    %c0 = arith.constant 0 : index
    %c0_0 = arith.constant 0 : index
    %1 = vector.load %arg7[%c0, %c0_0] : memref<8x128xf32, #tpu.memory_space<vmem>>, vector<8x128xf32>
    tpu.vector_store %arg7[%c0, %c0_0], %0 {strides = array<i32>} : memref<8x128xf32, #tpu.memory_space<vmem>>, vector<8x128xf32>,
    %c0_1 = arith.constant 0 : index
    %c0_2 = arith.constant 0 : index
    %2 = vector.load %arg1[%c0_1, %c0_2] : memref<8x16xf32, #tpu.memory_space<vmem>>, vector<8x16xf32>
    %c0_3 = arith.constant 0 : index
    %c0_4 = arith.constant 0 : index
    %3 = vector.load %arg7[%c0_3, %c0_4] : memref<8x128xf32, #tpu.memory_space<vmem>>, vector<8x16xf32>
    tpu.vector_store %arg7[%c0_3, %c0_4], %2 {strides = array<i32>} : memref<8x128xf32, #tpu.memory_space<vmem>>, vector<8x16xf32>,
    %c0_5 = arith.constant 0 : index
    %c0_6 = arith.constant 0 : index
    %4 = vector.load %arg2[%c0_5, %c0_6] : memref<8x8xf32, #tpu.memory_space<vmem>>, vector<8x8xf32>
    %c0_7 = arith.constant 0 : index
    %c16 = arith.constant 16 : index
    %5 = vector.load %arg7[%c0_7, %c16] : memref<8x128xf32, #tpu.memory_space<vmem>>, vector<8x8xf32>
    tpu.vector_store %arg7[%c0_7, %c16], %4 {strides = array<i32>} : memref<8x128xf32, #tpu.memory_space<vmem>>, vector<8x8xf32>,
    %c0_8 = arith.constant 0 : index
    %c0_9 = arith.constant 0 : index
    %6 = vector.load %arg3[%c0_8, %c0_9] : memref<8x16xf32, #tpu.memory_space<vmem>>, vector<8x16xf32>
    %c0_10 = arith.constant 0 : index
    %c24 = arith.constant 24 : index
    %7 = vector.load %arg7[%c0_10, %c24] : memref<8x128xf32, #tpu.memory_space<vmem>>, vector<8x16xf32>
    tpu.vector_store %arg7[%c0_10, %c24], %6 {strides = array<i32>} : memref<8x128xf32, #tpu.memory_space<vmem>>, vector<8x16xf32>,
    %c0_11 = arith.constant 0 : index
    %c0_12 = arith.constant 0 : index
    %8 = vector.load %arg4[%c0_11, %c0_12] : memref<384x256xbf16, #tpu.memory_space<vmem>>, vector<128x256xbf16>
    %c128 = arith.constant 128 : index
    %c0_13 = arith.constant 0 : index
    %9 = vector.load %arg4[%c128, %c0_13] : memref<384x256xbf16, #tpu.memory_space<vmem>>, vector<256x256xbf16>
    %c0_14 = arith.constant 0 : index
    %c0_15 = arith.constant 0 : index
    %10 = vector.load %arg5[%c0_14, %c0_15] : memref<4x256xf32, #tpu.memory_space<vmem>>, vector<1x256xf32>
    %c1 = arith.constant 1 : index
    %c0_16 = arith.constant 0 : index
    %11 = vector.load %arg5[%c1, %c0_16] : memref<4x256xf32, #tpu.memory_space<vmem>>, vector<1x256xf32>
    %c2 = arith.constant 2 : index
    %c0_17 = arith.constant 0 : index
    %12 = vector.load %arg5[%c2, %c0_17] : memref<4x256xf32, #tpu.memory_space<vmem>>, vector<1x256xf32>
    %c3 = arith.constant 3 : index
    %c0_18 = arith.constant 0 : index
    %13 = vector.load %arg5[%c3, %c0_18] : memref<4x256xf32, #tpu.memory_space<vmem>>, vector<1x1xf32>
    %c0_19 = arith.constant 0 : index
    %c0_20 = arith.constant 0 : index
    %14 = vector.load %arg7[%c0_19, %c0_20] : memref<8x128xf32, #tpu.memory_space<vmem>>, vector<8x128xf32>
    %15 = arith.truncf %14 : vector<8x128xf32> to vector<8x128xbf16>
    %cst_21 = arith.constant dense<0.000000e+00> : vector<8x256xf32>
    %16 = tpu.matmul %15, %8, %cst_21 {dimension_numbers = #tpu.dot_dimension_numbers<[1], [0], [0], [1], [0, 0, 1, 1], [], []>} : vector<8x128xbf16>, vector<128x256xbf16>, vector<8x256xf32> -> vector<8x256xf32>
    %17 = vector.broadcast %10 : vector<1x256xf32> to vector<8x256xf32>
    %18 = arith.addf %16, %17 : vector<8x256xf32>
    %cst_22 = arith.constant 0.000000e+00 : f32
    %19 = vector.broadcast %cst_22 : f32 to vector<8x256xf32>
    %20 = arith.maximumf %18, %19 : vector<8x256xf32>
    %21 = arith.truncf %20 : vector<8x256xf32> to vector<8x256xbf16>
    %cst_23 = arith.constant dense<0.000000e+00> : vector<8x256xf32>
    %22 = tpu.matmul %21, %9, %cst_23 {dimension_numbers = #tpu.dot_dimension_numbers<[1], [0], [0], [1], [0, 0, 1, 1], [], []>} : vector<8x256xbf16>, vector<256x256xbf16>, vector<8x256xf32> -> vector<8x256xf32>
    %23 = vector.broadcast %11 : vector<1x256xf32> to vector<8x256xf32>
    %24 = arith.addf %22, %23 : vector<8x256xf32>
    %cst_24 = arith.constant 0.000000e+00 : f32
    %25 = vector.broadcast %cst_24 : f32 to vector<8x256xf32>
    %26 = arith.maximumf %24, %25 : vector<8x256xf32>
    %27 = tpu.transpose %26, [1, 0] : vector<8x256xf32> -> vector<256x8xf32>
    %cst_25 = arith.constant dense<0.000000e+00> : vector<1x8xf32>
    %28 = tpu.matmul %12, %27, %cst_25 {dimension_numbers = #tpu.dot_dimension_numbers<[1], [0], [0], [1], [0, 0, 1, 1], [], []>} : vector<1x256xf32>, vector<256x8xf32>, vector<1x8xf32> -> vector<1x8xf32>
    %29 = vector.broadcast %13 : vector<1x1xf32> to vector<1x8xf32>
    %30 = arith.addf %28, %29 : vector<1x8xf32>
    %c0_26 = arith.constant 0 : index
    %c0_27 = arith.constant 0 : index
    %31 = vector.load %arg6[%c0_26, %c0_27] : memref<1x8xf32, #tpu.memory_space<vmem>>, vector<1x8xf32>
    tpu.vector_store %arg6[%c0_26, %c0_27], %30 {strides = array<i32>} : memref<1x8xf32, #tpu.memory_space<vmem>>, vector<1x8xf32>,
    return
  }
  func.func @transform_0(%arg0: i32) -> (i32, i32) {
    %c0_i32 = arith.constant 0 : i32
    %c0_i32_0 = arith.constant 0 : i32
    return %arg0, %c0_i32 : i32, i32
  }
  func.func @transform_1(%arg0: i32) -> (i32, i32) {
    %c0_i32 = arith.constant 0 : i32
    %c0_i32_0 = arith.constant 0 : i32
    return %arg0, %c0_i32 : i32, i32
  }
  func.func @transform_2(%arg0: i32) -> (i32, i32) {
    %c0_i32 = arith.constant 0 : i32
    %c0_i32_0 = arith.constant 0 : i32
    return %arg0, %c0_i32 : i32, i32
  }
  func.func @transform_3(%arg0: i32) -> (i32, i32) {
    %c0_i32 = arith.constant 0 : i32
    %c0_i32_0 = arith.constant 0 : i32
    %c0_i32_1 = arith.constant 0 : i32
    return %c0_i32, %c0_i32_0 : i32, i32
  }
  func.func @transform_4(%arg0: i32) -> (i32, i32) {
    %c0_i32 = arith.constant 0 : i32
    %c0_i32_0 = arith.constant 0 : i32
    %c0_i32_1 = arith.constant 0 : i32
    return %c0_i32, %c0_i32_0 : i32, i32
  }
  func.func @transform_5(%arg0: i32) -> (i32, i32) {
    %c0_i32 = arith.constant 0 : i32
    %c0_i32_0 = arith.constant 0 : i32
    return %c0_i32, %arg0 : i32, i32
  }
}

</mosaic_0001>

<bundles_post_ra>
// kernel: reward_forward.1
= control target key start
LH: loop header
LB: loop body
LE: loop exit
PB: predicated region body
PF: predicated region fallthrough
CT: control target
= control target key end

     0   :  { %10 = vsyncpa [#allocation4], 0  ;;  %s982_s0 = inlined_call_operand.hbm [shape: f32[8,16], index: 0, kind: input, shape index: {}]   ;;  %s983_s1 = inlined_call_operand.hbm [shape: f32[8,8], index: 1, kind: input, shape index: {}]   ;;  %s984_s2 = inlined_call_operand.hbm [shape: f32[8,16], index: 2, kind: input, shape index: {}]   ;;  %s985_s3 = inlined_call_operand.hbm [shape: bf16[384,256], index: 3, kind: input, shape index: {}]   ;;  %s986_s4 = inlined_call_operand.vmem [shape: f32[4,256], index: 4, kind: input, shape index: {}]   ;;  %s987_s5 = inlined_call_operand.hbm [shape: f32[1,8], index: 5, kind: output, shape index: {}]  }
   0x1   :  { %11 = vsyncpa [#allocation7], 0 }
   0x2   :  { %12 = vsyncpa [#allocation10], 0 }
   0x3   :  { %13 = vsyncpa [#allocation5], 0  ;;  %s861_s18 = smov [#allocation6]   ;;  %s862_s20 = smov [#allocation3]  }
   0x4   :  { %s30_s19 = sshll.u32 %s861_s18, 4  ;;  %s20_s21 = sshll.u32 %s862_s20, 4  ;;  %s31_s19 = int_to_ptr.vmem [resolvable:$true] %s30_s19  ;;  %s21_s21 = int_to_ptr.vmem [resolvable:$true] %s20_s21 }
   0x5   :  { %s743_s24 = scalar_lea.hbm %s983_s1, 128 }
   0x6   :  { %p744_p0 = scmp.ne.s32.totalorder %s983_s1, %s743_s24  ;;  %p747_p1 = scmp.lt.u32.totalorder %s743_s24, %s983_s1 }
   0x8   :  { %p749_p2 = pnand %p747_p1, %p744_p0 }
   0xa   :  { %752 = shalt.err (!%p749_p2)
}
   0xb   :  { %s753_s29 = scalar_lea.vmem %s31_s19, 128  ;;  %p758_p4 = scmp.lt.s32.totalorder %s31_s19, %s31_s19 }
   0xc   :  { %p754_p3 = scmp.ne.s32.totalorder %s31_s19, %s753_s29  ;;  %p759_p5 = scmp.lt.s32.totalorder %s753_s29, %s753_s29 }
   0xe   :  { %p760_p6 = por %p759_p5, %p758_p4 }
  0x10   :  { %p761_p7 = pnand %p760_p6, %p754_p3 }
  0x12   :  { %764 = shalt.err (!%p761_p7)
}
  0x13   :  { %33 = dma.hbm_to_vmem [thread:$0]  %s983_s1, 128, %s31_s19, [#allocation7]  }
  0x14   :  { %s765_s9 = scalar_lea.hbm %s982_s0, 128 }
  0x15   :  { %p766_p8 = scmp.ne.s32.totalorder %s982_s0, %s765_s9  ;;  %p769_p9 = scmp.lt.u32.totalorder %s765_s9, %s982_s0 }
  0x17   :  { %p771_p10 = pnand %p769_p9, %p766_p8 }
  0x19   :  { %774 = shalt.err (!%p771_p10)
}
  0x1a   :  { %s775_s14 = scalar_lea.vmem %s21_s21, 128  ;;  %p780_p12 = scmp.lt.s32.totalorder %s21_s21, %s21_s21 }
  0x1b   :  { %p776_p11 = scmp.ne.s32.totalorder %s21_s21, %s775_s14  ;;  %p781_p13 = scmp.lt.s32.totalorder %s775_s14, %s775_s14 }
  0x1d   :  { %p782_p0 = por %p781_p13, %p780_p12 }
  0x1f   :  { %p783_p1 = pnand %p782_p0, %p776_p11 }
  0x21   :  { %786 = shalt.err (!%p783_p1)
}
  0x22   :  { %23 = dma.hbm_to_vmem [thread:$0]  %s982_s0, 128, %s21_s21, [#allocation4]  }
  0x23   :  { %s863_s16 = smov [#allocation8]   ;;  %s864_s18 = smov [#allocation9]  }
  0x24   :  { %s40_s17 = sshll.u32 %s863_s16, 4  ;;  %s49_s19 = sshll.u32 %s864_s18, 4  ;;  %s41_s17 = int_to_ptr.vmem [resolvable:$true] %s40_s17  ;;  %s927_s19 = int_to_ptr.vmem [resolvable:$true] %s49_s19 }
  0x25   :  { %s787_s23 = scalar_lea.hbm %s984_s2, 128 }
  0x26   :  { %p788_p2 = scmp.ne.s32.totalorder %s984_s2, %s787_s23  ;;  %p791_p3 = scmp.lt.u32.totalorder %s787_s23, %s984_s2 }
  0x28   :  { %p793_p4 = pnand %p791_p3, %p788_p2 }
  0x2a   :  { %796 = shalt.err (!%p793_p4)
}
  0x2b   :  { %s797_s0 = scalar_lea.vmem %s41_s17, 128  ;;  %p802_p6 = scmp.lt.s32.totalorder %s41_s17, %s41_s17 }
  0x2c   :  { %p798_p5 = scmp.ne.s32.totalorder %s41_s17, %s797_s0  ;;  %p803_p7 = scmp.lt.s32.totalorder %s797_s0, %s797_s0 }
  0x2e   :  { %p804_p8 = por %p803_p7, %p802_p6 }
  0x30   :  { %p805_p9 = pnand %p804_p8, %p798_p5 }
  0x32   :  { %808 = shalt.err (!%p805_p9)
}
  0x33   :  { %43 = dma.hbm_to_vmem [thread:$0]  %s984_s2, 128, %s41_s17, [#allocation7]  }
  0x34   :  { %s809_s6 = scalar_lea.hbm %s985_s3, 6144 }
  0x35   :  { %p810_p10 = scmp.ne.s32.totalorder %s985_s3, %s809_s6  ;;  %p813_p11 = scmp.lt.u32.totalorder %s809_s6, %s985_s3 }
  0x37   :  { %p815_p12 = pnand %p813_p11, %p810_p10 }
  0x39   :  { %818 = shalt.err (!%p815_p12)
}
  0x3a   :  { %s819_s11 = scalar_lea.vmem %s927_s19, 6144  ;;  %p824_p0 = scmp.lt.s32.totalorder %s927_s19, %s927_s19 }
  0x3b   :  { %p820_p13 = scmp.ne.s32.totalorder %s927_s19, %s819_s11  ;;  %p825_p1 = scmp.lt.s32.totalorder %s819_s11, %s819_s11 }
  0x3d   :  { %p826_p2 = por %p825_p1, %p824_p0 }
  0x3f   :  { %p827_p3 = pnand %p826_p2, %p820_p13 }
  0x41   :  { %830 = shalt.err (!%p827_p3)
}
  0x42   :  { %s865_s2 = smov 128   ;;  %s866_s12 = smov 8  }
  0x43   :  { %55 = dma.hbm_to_vmem [thread:$0]  %s985_s3, 6144, %s927_s19, [#allocation10], %s865_s2, %s865_s2, %s866_s12  }
  0x44   :  { %853 = dma.done.wait [#allocation4], 128  }
  0x45   :  { %854 = vsyncadd [#allocation4], 4294967168 }
  0x46   :  { %855 = dma.done.wait [#allocation7], 256  }
  0x47   :  { %856 = vsyncadd [#allocation7], 4294967040 }
  0x48   :  { %857 = dma.done.wait [#allocation10], 6144  }
  0x49   :  { %858 = vsyncadd [#allocation10], 4294961152  ;;  %v867_v0 = vmov 0.0   ;;  %v868_v1 = vmov 0   ;;  %v75_v2 = vld [vmem:[#allocation6] sm:$0xff]  ;;  %v82_v3 = vld [vmem:[#allocation8] sm:$0xff]  ;;  %v146_v57 = vlaneseq }
  0x4a   :  { %71 = vst [vmem:[#allocation2] sm:$0xff] %v867_v0  ;;  %268 = vmatprep.mubr.bf16.mxu0 %v868_v1  ;;  %669 = vset.pattern.permute.xlu1 %v868_v1  ;;  %s869_s1 = smov 16   ;;  %v671_v4 = vld [vmem:[#allocation9 + $0x4] ss:$8 sps:$4 sm:$0xff]   ;;  %v673_v5 = vld [vmem:[#allocation9] ss:$8 sps:$4 sm:$0xff]  }
  0x4b   :  { %670 = vset.pattern.permute.xlu0 %v868_v1  ;;  %v674_v6 = vld [vmem:[#allocation9 + $0x14] ss:$8 sps:$4 sm:$0xff]   ;;  %236 = vmatprep.subr.bf16.mxu0 %v671_v4  ;;  %v676_v7 = vld [vmem:[#allocation9 + $0x10] ss:$8 sps:$4 sm:$0xff]   ;;  %s870_s3 = smov 24   ;;  %vm73_vm0 = vcmask 130048  }
  0x4c   :  { %77 = vrot.lane.b32.xlu0 %v75_v2, %s869_s1  ;;  %237 = vmatpush1.bf16.msra.mxu0 %v673_v5  ;;  %v677_v8 = vld [vmem:[#allocation9 + $0x24] ss:$8 sps:$4 sm:$0xff]   ;;  %v679_v10 = vld [vmem:[#allocation9 + $0x20] ss:$8 sps:$4 sm:$0xff]   ;;  %v680_v11 = vld [vmem:[#allocation9 + $0x34] ss:$8 sps:$4 sm:$0xff]  }
  0x4d   :  { %238 = vmatprep.subr.bf16.mxu0 %v674_v6  ;;  %v72_v9 = vld [vmem:[#allocation3] sm:$0xff]  ;;  %v682_v12 = vld [vmem:[#allocation9 + $0x30] ss:$8 sps:$4 sm:$0xff]   ;;  %v698_v16 = vld [vmem:[#allocation9 + $0x94] ss:$8 sps:$4 sm:$0xff]   ;;  %vm80_vm1 = vcmask 195712  }
  0x4e   :  { %74 = vst.msk [vmem:[#allocation2] sm:$0xff] %vm73_vm0, %v72_v9  ;;  %v683_v13 = vld [vmem:[#allocation9 + $0x44] ss:$8 sps:$4 sm:$0xff]   ;;  %v697_v15 = vld [vmem:[#allocation9 + $0x80] ss:$8 sps:$4 sm:$0xff]   ;;  %vm87_vm2 = vcmask 326848  }
  0x4f   :  { %v695_v14 = vld [vmem:[#allocation9 + $0x84] ss:$8 sps:$4 sm:$0xff]   ;;  %v700_v17 = vld [vmem:[#allocation9 + $0x90] ss:$8 sps:$4 sm:$0xff]   ;;  %v685_v18 = vld [vmem:[#allocation9 + $0x40] ss:$8 sps:$4 sm:$0xff]  }
  0x50   :  { %84 = vrot.lane.b32.xlu0 %v82_v3, %s870_s3  ;;  %239 = vmatpush1.bf16.msra.mxu0 %v676_v7  ;;  %v701_v19 = vld [vmem:[#allocation9 + $0xa4] ss:$8 sps:$4 sm:$0xff]   ;;  %v686_v20 = vld [vmem:[#allocation9 + $0x54] ss:$8 sps:$4 sm:$0xff]   ;;  %v703_v21 = vld [vmem:[#allocation9 + $0xa0] ss:$8 sps:$4 sm:$0xff]  }
  0x51   :  { %240 = vmatprep.subr.bf16.mxu0 %v677_v8  ;;  %452 = vmatprep.subr.bf16.mxu1 %v695_v14  ;;  %v688_v22 = vld [vmem:[#allocation9 + $0x50] ss:$8 sps:$4 sm:$0xff]   ;;  %v704_v23 = vld [vmem:[#allocation9 + $0xb4] ss:$8 sps:$4 sm:$0xff]   ;;  %v689_v24 = vld [vmem:[#allocation9 + $0x64] ss:$8 sps:$4 sm:$0xff]  }
  0x52   :  { %453 = vmatpush1.bf16.msra.mxu1 %v697_v15  ;;  %v706_v25 = vld [vmem:[#allocation9 + $0xb0] ss:$8 sps:$4 sm:$0xff]   ;;  %v691_v26 = vld [vmem:[#allocation9 + $0x60] ss:$8 sps:$4 sm:$0xff]   ;;  %v707_v27 = vld [vmem:[#allocation9 + $0xc4] ss:$8 sps:$4 sm:$0xff]  }
  0x53   :  { %454 = vmatprep.subr.bf16.mxu1 %v698_v16  ;;  %v692_v28 = vld [vmem:[#allocation9 + $0x74] ss:$8 sps:$4 sm:$0xff]   ;;  %v709_v29 = vld [vmem:[#allocation9 + $0xc0] ss:$8 sps:$4 sm:$0xff]   ;;  %v694_v30 = vld [vmem:[#allocation9 + $0x70] ss:$8 sps:$4 sm:$0xff]  }
  0x54   :  { %241 = vmatpush1.bf16.msra.mxu0 %v679_v10  ;;  %v710_v31 = vld [vmem:[#allocation9 + $0xd4] ss:$8 sps:$4 sm:$0xff]   ;;  %v712_v32 = vld [vmem:[#allocation9 + $0xd0] ss:$8 sps:$4 sm:$0xff]   ;;  %v713_v33 = vld [vmem:[#allocation9 + $0xe4] ss:$8 sps:$4 sm:$0xff]  }
  0x55   :  { %242 = vmatprep.subr.bf16.mxu0 %v680_v11  ;;  %v715_v34 = vld [vmem:[#allocation9 + $0xe0] ss:$8 sps:$4 sm:$0xff]   ;;  %v716_v35 = vld [vmem:[#allocation9 + $0xf4] ss:$8 sps:$4 sm:$0xff]   ;;  %v718_v36 = vld [vmem:[#allocation9 + $0xf0] ss:$8 sps:$4 sm:$0xff]  }
  0x56   :  { %455 = vmatpush1.bf16.msra.mxu1 %v700_v17  ;;  %v719_v37 = vld [vmem:[#allocation9 + $0x104] ss:$8 sps:$4 sm:$0xff]   ;;  %v721_v38 = vld [vmem:[#allocation9 + $0x100] ss:$8 sps:$4 sm:$0xff]   ;;  %v722_v39 = vld [vmem:[#allocation9 + $0x114] ss:$8 sps:$4 sm:$0xff]  }
  0x57   :  { %456 = vmatprep.subr.bf16.mxu1 %v701_v19  ;;  %v724_v40 = vld [vmem:[#allocation9 + $0x110] ss:$8 sps:$4 sm:$0xff]   ;;  %v725_v41 = vld [vmem:[#allocation9 + $0x124] ss:$8 sps:$4 sm:$0xff]   ;;  %v727_v42 = vld [vmem:[#allocation9 + $0x120] ss:$8 sps:$4 sm:$0xff]  }
  0x58   :  { %243 = vmatpush1.bf16.msra.mxu0 %v682_v12  ;;  %v728_v43 = vld [vmem:[#allocation9 + $0x134] ss:$8 sps:$4 sm:$0xff]   ;;  %v730_v44 = vld [vmem:[#allocation9 + $0x130] ss:$8 sps:$4 sm:$0xff]   ;;  %v731_v45 = vld [vmem:[#allocation9 + $0x144] ss:$8 sps:$4 sm:$0xff]  }
  0x59   :  { %244 = vmatprep.subr.bf16.mxu0 %v683_v13  ;;  %v733_v46 = vld [vmem:[#allocation9 + $0x140] ss:$8 sps:$4 sm:$0xff]   ;;  %v734_v47 = vld [vmem:[#allocation9 + $0x154] ss:$8 sps:$4 sm:$0xff]   ;;  %v736_v48 = vld [vmem:[#allocation9 + $0x150] ss:$8 sps:$4 sm:$0xff]  }
  0x5a   :  { %457 = vmatpush1.bf16.msra.mxu1 %v703_v21  ;;  %v737_v53 = vld [vmem:[#allocation9 + $0x164] ss:$8 sps:$4 sm:$0xff]   ;;  %v739_v54 = vld [vmem:[#allocation9 + $0x160] ss:$8 sps:$4 sm:$0xff]   ;;  %v740_v55 = vld [vmem:[#allocation9 + $0x174] ss:$8 sps:$4 sm:$0xff]  }
  0x5b   :  { %458 = vmatprep.subr.bf16.mxu1 %v704_v23  ;;  %v742_v56 = vld [vmem:[#allocation9 + $0x170] ss:$8 sps:$4 sm:$0xff]   ;;  %v147_v58 = vshrl.u32 %v146_v57, 7  ;;  %v137_v60 = vld [vmem:[%s986_s4] ss:$4 sm:$0x3] }
  0x5c   :  { %245 = vmatpush1.bf16.msra.mxu0 %v685_v18  ;;  %v608_v10 = vld [vmem:[%s986_s4 + $0x2] ss:$4 sm:$0x3]  ;;  %v142_v12 = vld [vmem:[%s986_s4 + $0x3] sm:$0x1]  ;;  %vm588_vm3 = vcmask 57344  }
  0x5d   :  { %246 = vmatprep.subr.bf16.mxu0 %v686_v20  ;;  %v148_v59 = vsub.s32 0, %v147_v58  ;;  %v152_v61 = vsub.s32 1, %v147_v58  ;;  %497 = vperm.xlu1 %669, %v142_v12   ;;  %v607_v13 = vld [vmem:[%s986_s4 + $0x1] ss:$4 sm:$0x3]  ;;  %s872_s4 = smov [#allocation11]  }
  0x5e   :  { %459 = vmatpush1.bf16.msra.mxu1 %v706_v25  ;;  %v871_v25 = vmov 839922192   ;;  %s596_s24 = sshll.u32 %s872_s4, 4  ;;  %s597_s24 = int_to_ptr.vmem [resolvable:$true] %s596_s24 }
  0x5f   :  { %460 = vmatprep.subr.bf16.mxu1 %v707_v27  ;;  %v149_v62 = vrot.slane %v137_v60, %v148_v59  ;;  %v153_v63 = vrot.slane %v137_v60, %v152_v61  ;;  %v515_v11 = vrot.slane %v608_v10, %v152_v61  ;;  %v285_v14 = vrot.slane %v607_v13, %v148_v59  ;;  %s831_s25 = scalar_lea.vmem %s597_s24, 16  ;;  %s835_s26 = scalar_lea.vmem %s597_s24, 32 }
  0x60   :  { %247 = vmatpush1.bf16.msra.mxu0 %v688_v22  ;;  %v289_v15 = vrot.slane %v607_v13, %v152_v61  ;;  %p832_p4 = scmp.ne.s32.totalorder %s597_s24, %s831_s25  ;;  %p836_p5 = scmp.lt.s32.totalorder %s597_s24, %s597_s24 }
  0x61   :  { %248 = vmatprep.subr.bf16.mxu0 %v689_v24  ;;  %v511_v24 = vrot.slane %v608_v10, %v148_v59  ;;  %p837_p6 = scmp.lt.s32.totalorder %s835_s26, %s831_s25 }
  0x62   :  { %461 = vmatpush1.bf16.msra.mxu1 %v709_v29 }
  0x63   :  { %462 = vmatprep.subr.bf16.mxu1 %v710_v31  ;;  %p838_p7 = por %p837_p6, %p836_p5 }
  0x64   :  { %249 = vmatpush1.bf16.msra.mxu0 %v691_v26  ;;  %v501_v26 = vunpack.c.l.s4 %v871_v25 }
  0x65   :  { %250 = vmatprep.subr.bf16.mxu0 %v692_v28  ;;  %p839_p8 = pnand %p838_p7, %p832_p4 }
  0x66   :  { %463 = vmatpush1.bf16.msra.mxu1 %v712_v32  ;;  %v502_v27 = vunpack.c.0.s8 %v501_v26 }
  0x67   :  { %464 = vmatprep.subr.bf16.mxu1 %v713_v33 }
  0x68   :  { %251 = vmatpush1.bf16.msra.mxu0 %v694_v30  ;;  %v505_v28 = vsub.s32 %v502_v27, %v147_v58 }
  0x6a   :  { %465 = vmatpush1.bf16.msra.mxu1 %v715_v34 }
  0x6b   :  { %466 = vmatprep.subr.bf16.mxu1 %v716_v35 }
  0x6e   :  { %467 = vmatpush1.bf16.msra.mxu1 %v718_v36 }
  0x6f   :  { %468 = vmatprep.subr.bf16.mxu1 %v719_v37 }
  0x72   :  { %469 = vmatpush1.bf16.msra.mxu1 %v721_v38 }
  0x73   :  { %470 = vmatprep.subr.bf16.mxu1 %v722_v39 }
  0x76   :  { %471 = vmatpush1.bf16.msra.mxu1 %v724_v40 }
  0x77   :  { %472 = vmatprep.subr.bf16.mxu1 %v725_v41 }
  0x7a   :  { %473 = vmatpush1.bf16.msra.mxu1 %v727_v42 }
  0x7b   :  { %474 = vmatprep.subr.bf16.mxu1 %v728_v43 }
  0x7e   :  { %475 = vmatpush1.bf16.msra.mxu1 %v730_v44 }
  0x7f   :  { %476 = vmatprep.subr.bf16.mxu1 %v731_v45 }
  0x82   :  { %477 = vmatpush1.bf16.msra.mxu1 %v733_v46 }
  0x83   :  { %478 = vmatprep.subr.bf16.mxu1 %v734_v47 }
  0x86   :  { %479 = vmatpush1.bf16.msra.mxu1 %v736_v48 }
  0x87   :  { %480 = vmatprep.subr.bf16.mxu1 %v737_v53 }
  0x8a   :  { %481 = vmatpush1.bf16.msra.mxu1 %v739_v54 }
  0x8b   :  { %482 = vmatprep.subr.bf16.mxu1 %v740_v55 }
  0x8e   :  { %483 = vmatpush1.bf16.msra.mxu1 %v742_v56 }
  0xbe   :  { %v78_v49 = vpop.permute.xlu0 %77 }
  0xbf   :  { %81 = vst.msk [vmem:[#allocation2] sm:$0xff] %vm80_vm1, %v78_v49 }
  0xc2   :  { %v85_v50 = vpop.permute.xlu0 %84 }
  0xc3   :  { %88 = vst.msk [vmem:[#allocation2] sm:$0xff] %vm87_vm2, %v85_v50 }
  0xca   :  { %v143_v51 = vld [vmem:[#allocation2] sm:$0xff] }
  0xcb   :  { %v144_v52 = vpack.c.bf16 %v143_v51, %v143_v51 }
  0xcd   :  { %269 = vmatmul.mubr.bf16.vlgmr.msra.gmra.mrb[0].mxu0 %v144_v52 }
  0xce   :  { %582 = vmatprep.mubr.f32.mxu0 %v515_v11 }
  0xdc   :  { %v498_v29 = vpop.permute.xlu1 %497 }
  0xdd   :  { %v506_v30 = vrot.slane %v498_v29, %v505_v28 }
 0x1a0   :  { %v270_v0 = vpop.f32.mrb[0].mxu0 }
 0x1a1   :  { %v271_v1 = vadd.f32 %v270_v0, %v149_v62  ;;  %v272_v2 = vpop.f32.mrb[1].mxu0 }
 0x1a2   :  { %v273_v3 = vadd.f32 %v272_v2, %v153_v63  ;;  %v274_v4 = vpop.f32.mrb[2].mxu0 }
 0x1a3   :  { %v277_v5 = vmax.f32 %v271_v1, 0.0  ;;  %v275_v6 = vpop.f32.mrb[3].mxu0 }
 0x1a4   :  { %v278_v7 = vmax.f32 %v273_v3, 0.0 }
 0x1a5   :  { %v279_v9 = vpack.c.bf16 %v277_v5, %v277_v5 }
 0x1a6   :  { %v280_v8 = vpack.c.bf16 %v278_v7, %v278_v7 }
 0x1a8   :  { %484 = vmatprep.mubr.bf16.mxu1 %v280_v8 }
 0x1a9   :  { %485 = vmatmul.mubr.bf16.vlgmr.msra.gmra.mrb[0].mxu1 %v279_v9 }
 0x27c   :  { %v486_v16 = vpop.f32.mrb[0].mxu1 }
 0x27d   :  { %v487_v17 = vadd.f32 %v486_v16, %v285_v14  ;;  %v488_v18 = vpop.f32.mrb[1].mxu1 }
 0x27e   :  { %v489_v19 = vadd.f32 %v488_v18, %v289_v15  ;;  %v490_v20 = vpop.f32.mrb[2].mxu1 }
 0x27f   :  { %v491_v21 = vpop.f32.mrb[3].mxu1  ;;  %v493_v23 = vmax.f32 %v487_v17, 0.0 }
 0x280   :  { %v494_v22 = vmax.f32 %v489_v19, 0.0 }
 0x282   :  { %518 = vmatprep.subr.mxu0 %v494_v22 }
 0x283   :  { %519 = vmatpush1.xpose.msra.mxu0 %v493_v23 }
 0x286   :  { %583 = vmatmul.mubr.f32.vlgmr.msra.gmra.mrb[4].mxu0 %v511_v24 }
 0x359   :  { %v584_v31 = vpop.f32.mrb[4].mxu0 }
 0x35a   :  { %v585_v32 = vadd.f32 %v584_v31, %v506_v30  ;;  %v586_v33 = vpop.f32.mrb[5].mxu0 }
 0x35c   :  { %589 = vst.msk [vmem:[#allocation11] sm:$0x1] %vm588_vm3, %v585_v32 }
 0x35d   :  { %842 = shalt.err (!%p839_p8)
}
 0x35e   :  { %s843_s21 = scalar_lea.hbm %s987_s5, 16 }
 0x35f   :  { %p844_p9 = scmp.ne.s32.totalorder %s987_s5, %s843_s21  ;;  %p847_p10 = scmp.lt.u32.totalorder %s843_s21, %s987_s5 }
 0x361   :  { %p849_p11 = pnand %p847_p10, %p844_p9 }
 0x363   :  { %852 = shalt.err (!%p849_p11)
}
 0x364   :  { %599 = dma.vmem_to_hbm [thread:$0]  %s597_s24, 16, %s987_s5, [#allocation5]  }
 0x365   :  { %859 = dma.done.wait [#allocation5], 16  }
 0x366   :  { %860 = vsyncadd [#allocation5], 4294967280 }
 0x367   :  { %603 = vsyncpa [#allocation4], 1 }
 0x368   :  { %604 = vsyncpa [#allocation7], 1 }
 0x369   :  { %605 = vsyncpa [#allocation10], 1 }
 0x36a   :  { %606 = vsyncpa [#allocation5], 1 }

</bundles_post_ra>
